<compile_context>
chip_gen: v5e
topology: v5e:2x2
jax: 0.10.0
libtpu: 0.0.40
codegen_flags: <defaults>
</compile_context>

<pallas_src>
import functools

import jax
import jax.numpy as jnp
from jax.experimental import pallas as pl
from jax.experimental.pallas import tpu as pltpu

L_LABELS = 3


def _round_up(x, m):
    return ((x + m - 1) // m) * m


def _mce_kernel(w_ref, pred_ref, tgt_ref, out_ref, acc_ref, *,
                gamma, batch, b_lane, tbm, mask_from):
    c = pl.program_id(0)          # batch half (maps to a TensorCore on v7x)
    i = pl.program_id(1)          # batch tile within this half (reduction axis)

    @pl.when(i == 0)
    def _init():
        acc_ref[...] = jnp.zeros_like(acc_ref)

    total = None
    for l in range(L_LABELS):
        a = pred_ref[0, l, 0].astype(jnp.float32)    # (8, tbm) class-0 logits
        b = pred_ref[1, l, 0].astype(jnp.float32)    # (8, tbm) class-1 logits
        t = tgt_ref[l, 0]                            # (8, tbm) int32 targets in {0, 1}
        is0 = t == 0

        # Two-class closed form: x = (other-class logit) - (chosen-class logit);
        # nll = -log_softmax(pred)[target] = softplus(x) (numerically stable form).
        diff = a - b
        x = jnp.where(is0, -diff, diff)
        e = jnp.exp(-jnp.abs(x))
        nll = jnp.maximum(x, 0.0) + jnp.log1p(e)

        # Per-(label, class) weight: scalar select from SMEM, splat along lanes.
        term = jnp.where(is0, w_ref[2 * l], w_ref[2 * l + 1]) * nll

        if gamma != 0:
            # 1 - softmax[target] = sigmoid(x); reuse e = exp(-|x|) (no extra EUP exp).
            one_minus_p = jnp.where(x >= 0.0, 1.0, e) * pl.reciprocal(1.0 + e, approx=True)
            g_int = int(gamma)
            if float(gamma) == float(g_int) and g_int >= 1:
                focal = one_minus_p
                for _ in range(g_int - 1):           # integer gamma: VPU multiplies only
                    focal = focal * one_minus_p
            else:
                focal = jnp.power(one_minus_p, jnp.float32(gamma))
            term = term * focal

        total = term if total is None else total + term

    if mask_from is None:
        # Every block of every core half is provably all-valid: no mask code at all.
        acc_ref[...] += total
    else:
        if mask_from > 0:
            @pl.when(i < mask_from)
            def _accumulate_clean():
                acc_ref[...] += total

        @pl.when(i >= mask_from)
        def _accumulate_masked():
            # Batch element at (core half c, sublane s, lane m) has flat batch index
            # (c*8 + s) * b_lane + m; mask ragged-trailing-block garbage and the <16-row pad.
            m = i * tbm + jax.lax.broadcasted_iota(jnp.int32, total.shape, 1)
            s = jax.lax.broadcasted_iota(jnp.int32, total.shape, 0)
            flat = (c * 8 + s) * b_lane + m
            valid = jnp.logical_and(m < b_lane, flat < batch)
            acc_ref[...] += jnp.where(valid, total, 0.0)

    @pl.when(i == pl.num_programs(1) - 1)
    def _finalize():
        out_ref[...] = jnp.broadcast_to(jnp.sum(acc_ref[...]), out_ref.shape)


def matrix_cross_entropy(pred, target, weight, gamma=0, block_b=131072):
    """pred: (B, L, 2) float logits; target: (B, L) int; weight: (L, 2) float -> scalar loss."""
    B, L, C = pred.shape
    if C != 2:
        raise ValueError("MatrixCrossEntropy kernel assumes class_num == 2")
    if L != L_LABELS:
        raise ValueError(f"MatrixCrossEntropy kernel assumes label_nums == {L_LABELS}")
    if gamma < 0:
        raise ValueError("gamma must be >= 0 (negative gamma would produce inf focal weights)")
    if B == 0:
        return jnp.float32(0.0)

    # Fold the batch into (2 core-halves, 8 sublanes, b_lane lanes): fully dense tiles and a
    # "parallel" leading grid axis for the two v7x TensorCores (no-op on 1-TC chips).
    b_pad = _round_up(B, 16)
    b_lane = b_pad // 16

    # Lane-axis tile: full extent if it fits, else a multiple of 128 (block_b = batch
    # elements per grid step = 8 * tbm). Capped so VMEM stays well inside v7x's 64 MiB.
    tbm = max(128, (int(block_b) // 8 // 128) * 128)
    tbm = min(tbm, 65536)
    if b_lane <= tbm:
        tbm = b_lane
        nb = 1
    else:
        nb = pl.cdiv(b_lane, tbm)

    # Lane-dense relayout: one transpose pass; pad only when B % 16 != 0 (and by < 16 rows).
    pred_t = jnp.transpose(pred, (2, 1, 0))             # (C, L, B)
    tgt_t = jnp.transpose(target.astype(jnp.int32))     # (L, B)
    if b_pad != B:
        pred_t = jnp.pad(pred_t, ((0, 0), (0, 0), (0, b_pad - B)))
        tgt_t = jnp.pad(tgt_t, ((0, 0), (0, b_pad - B)))
    pred_t = pred_t.reshape(C, L, 2, 8, b_lane)          # free contiguous reshape
    tgt_t = tgt_t.reshape(L, 2, 8, b_lane)
    w_flat = weight.astype(jnp.float32).reshape(-1)      # (6,) -> SMEM via scalar prefetch

    # Blocks i < mask_from are provably all-valid for every (core, sublane); later blocks mask
    # ragged-trailing-block garbage and the pad tail. mask_from=None => no mask code emitted.
    clean_lanes = max(B - 15 * b_lane, 0)
    mask_from = clean_lanes // tbm
    if mask_from >= nb:
        mask_from = None

    kernel = functools.partial(_mce_kernel, gamma=gamma, batch=B, b_lane=b_lane,
                               tbm=tbm, mask_from=mask_from)

    # Explicit scoped-VMEM budget: double-buffered pred+target blocks + accumulator + headroom.
    in_block_bytes = 4 * (C * L + L) * 8 * tbm
    vmem_bytes = 2 * in_block_bytes + 4 * 8 * tbm + (4 << 20)
    vmem_bytes = int(min(max(vmem_bytes, 16 << 20), 48 << 20))

    out = pl.pallas_call(
        kernel,
        out_shape=jax.ShapeDtypeStruct((2, 1, 1), jnp.float32),
        grid_spec=pltpu.PrefetchScalarGridSpec(
            num_scalar_prefetch=1,                              # weights -> SMEM scalars
            grid=(2, nb),
            in_specs=[
                pl.BlockSpec((C, L, 1, 8, tbm), lambda c, i, w: (0, 0, c, 0, i)),  # logits
                pl.BlockSpec((L, 1, 8, tbm), lambda c, i, w: (0, c, 0, i)),        # targets
            ],
            out_specs=pl.BlockSpec((1, 1, 1), lambda c, i, w: (c, 0, 0)),  # per-core partial
            scratch_shapes=[pltpu.VMEM((8, tbm), jnp.float32)],            # dense accumulator
        ),
        compiler_params=pltpu.CompilerParams(
            dimension_semantics=("parallel", "arbitrary"),
            vmem_limit_bytes=vmem_bytes,
        ),
    )(w_flat, pred_t, tgt_t)
    return jnp.sum(out)


def make_weight():
    # Matches: F.normalize(1 / torch.Tensor([[2492, 411], [2330, 624], [2120, 834]]), dim=1, p=1)
    counts = jnp.array(
        [[2492.0, 411.0], [2330.0, 624.0], [2120.0, 834.0]], dtype=jnp.float32
    )
    inv = 1.0 / counts
    return inv / jnp.sum(jnp.abs(inv), axis=1, keepdims=True)


def _reference(pred, target, weight, gamma):
    # Pure-JAX replica of the PyTorch forward.
    onehot = jax.nn.one_hot(target, pred.shape[-1], dtype=jnp.float32)
    logsm = jax.nn.log_softmax(pred.astype(jnp.float32), axis=2)
    if gamma == 0:
        focal = jnp.ones_like(logsm)   # torch.pow(x, 0) == 1 everywhere
    else:
        sm = jax.nn.softmax(pred.astype(jnp.float32), axis=2)
        focal = jnp.power(1.0 - sm, gamma)
    return -jnp.sum(focal * onehot * weight[None] * logsm)


if __name__ == "__main__":
    L, C = 3, 2  # label_nums, class_num
    weight = make_weight()

    key = jax.random.PRNGKey(0)
    k1, k2, k3, k4 = jax.random.split(key, 4)

    # Case 1: module defaults (gamma=0), tiny batch (core-half 1 is entirely masked pad).
    B = 8
    pred = jax.random.normal(k1, (B, L, C), dtype=jnp.float32)
    target = jax.random.randint(k2, (B, L), 0, C, dtype=jnp.int32)
    loss = jax.block_until_ready(matrix_cross_entropy(pred, target, weight, gamma=0))
    ref = _reference(pred, target, weight, gamma=0)
    assert jnp.allclose(loss, ref, rtol=1e-4, atol=1e-4), (loss, ref)

    # Case 2: focal gamma=2, B not a multiple of 16, small tile -> multi-block reduction with a
    # ragged trailing block on each core half. Looser tolerance because the focal term uses the
    # EUP approximate reciprocal (pl.reciprocal(approx=True)).
    B2 = 4001
    pred2 = jax.random.normal(k3, (B2, L, C), dtype=jnp.float32)
    target2 = jax.random.randint(k4, (B2, L), 0, C, dtype=jnp.int32)
    loss2 = jax.block_until_ready(
        matrix_cross_entropy(pred2, target2, weight, gamma=2, block_b=1024))
    ref2 = _reference(pred2, target2, weight, gamma=2)
    assert jnp.allclose(loss2, ref2, rtol=1e-2, atol=1e-2), (loss2, ref2)

    # Case 3: default (large) tile, B a multiple of 16 -> no pad and no mask code at all.
    B3 = 2048
    pred3 = jax.random.normal(k1, (B3, L, C), dtype=jnp.float32)
    target3 = jax.random.randint(k2, (B3, L), 0, C, dtype=jnp.int32)
    loss3 = jax.block_until_ready(matrix_cross_entropy(pred3, target3, weight, gamma=0))
    ref3 = _reference(pred3, target3, weight, gamma=0)
    assert jnp.allclose(loss3, ref3, rtol=1e-4, atol=1e-4), (loss3, ref3)

    print("KERNEL_OK")
</pallas_src>

<mosaic_0001>
module attributes {stable_mosaic.version = 11 : i64} {
  func.func @_mce_kernel(%arg0: i32, %arg1: i32, %arg2: memref<6xf32, #tpu.memory_space<smem>>, %arg3: memref<2x3x1x8x1xf32, #tpu.memory_space<vmem>>, %arg4: memref<3x1x8x1xi32, #tpu.memory_space<vmem>>, %arg5: memref<1x1x1xf32, #tpu.memory_space<vmem>>, %arg6: memref<8x1xf32, #tpu.memory_space<vmem>>) attributes {dimension_semantics = [#tpu.dimension_semantics<parallel>, #tpu.dimension_semantics<arbitrary>], iteration_bounds = array<i64: 2, 1>, scalar_prefetch = 1 : i64, scratch_operands = 1 : i64, tpu.core_type = #tpu.core_type<tc>, window_params = [{transform_indices = @transform_0, window_bounds = array<i64: 2, 3, 1, 8, 1>}, {transform_indices = @transform_1, window_bounds = array<i64: 3, 1, 8, 1>}, {transform_indices = @transform_2, window_bounds = array<i64: 1, 1, 1>}]} {
    %c0_i32 = arith.constant 0 : i32
    %0 = arith.cmpi eq, %arg1, %c0_i32 : i32
    %1 = arith.extui %0 : i1 to i32
    %c0_i32_0 = arith.constant 0 : i32
    %2 = arith.cmpi ne, %1, %c0_i32_0 : i32
    scf.if %2 {
      %cst_58 = arith.constant 0.000000e+00 : f32
      %89 = vector.broadcast %cst_58 : f32 to vector<8x1xf32>
      %c0_59 = arith.constant 0 : index
      %c0_60 = arith.constant 0 : index
      %90 = vector.load %arg6[%c0_59, %c0_60] : memref<8x1xf32, #tpu.memory_space<vmem>>, vector<8x1xf32>
      tpu.vector_store %arg6[%c0_59, %c0_60], %89 {strides = array<i32>} : memref<8x1xf32, #tpu.memory_space<vmem>>, vector<8x1xf32>,
    } else {
    }
    %c0 = arith.constant 0 : index
    %c0_1 = arith.constant 0 : index
    %c0_2 = arith.constant 0 : index
    %c0_3 = arith.constant 0 : index
    %c0_4 = arith.constant 0 : index
    %3 = vector.load %arg3[%c0, %c0_1, %c0_2, %c0_3, %c0_4] : memref<2x3x1x8x1xf32, #tpu.memory_space<vmem>>, vector<1x1x1x8x1xf32>
    %4 = vector.shape_cast %3 : vector<1x1x1x8x1xf32> to vector<8x1xf32>
    %c1 = arith.constant 1 : index
    %c0_5 = arith.constant 0 : index
    %c0_6 = arith.constant 0 : index
    %c0_7 = arith.constant 0 : index
    %c0_8 = arith.constant 0 : index
    %5 = vector.load %arg3[%c1, %c0_5, %c0_6, %c0_7, %c0_8] : memref<2x3x1x8x1xf32, #tpu.memory_space<vmem>>, vector<1x1x1x8x1xf32>
    %6 = vector.shape_cast %5 : vector<1x1x1x8x1xf32> to vector<8x1xf32>
    %c0_9 = arith.constant 0 : index
    %c0_10 = arith.constant 0 : index
    %c0_11 = arith.constant 0 : index
    %c0_12 = arith.constant 0 : index
    %7 = vector.load %arg4[%c0_9, %c0_10, %c0_11, %c0_12] : memref<3x1x8x1xi32, #tpu.memory_space<vmem>>, vector<1x1x8x1xi32>
    %8 = vector.shape_cast %7 : vector<1x1x8x1xi32> to vector<8x1xi32>
    %c0_i32_13 = arith.constant 0 : i32
    %9 = vector.broadcast %c0_i32_13 : i32 to vector<8x1xi32>
    %10 = arith.cmpi eq, %8, %9 : vector<8x1xi32>
    %11 = arith.subf %4, %6 : vector<8x1xf32>
    %cst = arith.constant 0.000000e+00 : f32
    %12 = vector.broadcast %cst : f32 to vector<8x1xf32>
    %13 = arith.subf %12, %11 : vector<8x1xf32>
    %14 = arith.select %10, %13, %11 : vector<8x1xi1>, vector<8x1xf32>
    %15 = math.absf %14 : vector<8x1xf32>
    %cst_14 = arith.constant 0.000000e+00 : f32
    %16 = vector.broadcast %cst_14 : f32 to vector<8x1xf32>
    %17 = arith.subf %16, %15 : vector<8x1xf32>
    %18 = math.exp %17 : vector<8x1xf32>
    %cst_15 = arith.constant 0.000000e+00 : f32
    %19 = vector.broadcast %cst_15 : f32 to vector<8x1xf32>
    %20 = arith.maximumf %14, %19 : vector<8x1xf32>
    %21 = math.log1p %18 : vector<8x1xf32>
    %22 = arith.addf %20, %21 : vector<8x1xf32>
    %c0_16 = arith.constant 0 : index
    %23 = memref.load %arg2[%c0_16] : memref<6xf32, #tpu.memory_space<smem>>
    %c1_17 = arith.constant 1 : index
    %24 = memref.load %arg2[%c1_17] : memref<6xf32, #tpu.memory_space<smem>>
    %25 = vector.broadcast %23 : f32 to vector<8x1xf32>
    %26 = vector.broadcast %24 : f32 to vector<8x1xf32>
    %27 = arith.select %10, %25, %26 : vector<8x1xi1>, vector<8x1xf32>
    %28 = arith.mulf %27, %22 : vector<8x1xf32>
    %c0_18 = arith.constant 0 : index
    %c1_19 = arith.constant 1 : index
    %c0_20 = arith.constant 0 : index
    %c0_21 = arith.constant 0 : index
    %c0_22 = arith.constant 0 : index
    %29 = vector.load %arg3[%c0_18, %c1_19, %c0_20, %c0_21, %c0_22] : memref<2x3x1x8x1xf32, #tpu.memory_space<vmem>>, vector<1x1x1x8x1xf32>
    %30 = vector.shape_cast %29 : vector<1x1x1x8x1xf32> to vector<8x1xf32>
    %c1_23 = arith.constant 1 : index
    %c1_24 = arith.constant 1 : index
    %c0_25 = arith.constant 0 : index
    %c0_26 = arith.constant 0 : index
    %c0_27 = arith.constant 0 : index
    %31 = vector.load %arg3[%c1_23, %c1_24, %c0_25, %c0_26, %c0_27] : memref<2x3x1x8x1xf32, #tpu.memory_space<vmem>>, vector<1x1x1x8x1xf32>
    %32 = vector.shape_cast %31 : vector<1x1x1x8x1xf32> to vector<8x1xf32>
    %c1_28 = arith.constant 1 : index
    %c0_29 = arith.constant 0 : index
    %c0_30 = arith.constant 0 : index
    %c0_31 = arith.constant 0 : index
    %33 = vector.load %arg4[%c1_28, %c0_29, %c0_30, %c0_31] : memref<3x1x8x1xi32, #tpu.memory_space<vmem>>, vector<1x1x8x1xi32>
    %34 = vector.shape_cast %33 : vector<1x1x8x1xi32> to vector<8x1xi32>
    %c0_i32_32 = arith.constant 0 : i32
    %35 = vector.broadcast %c0_i32_32 : i32 to vector<8x1xi32>
    %36 = arith.cmpi eq, %34, %35 : vector<8x1xi32>
    %37 = arith.subf %30, %32 : vector<8x1xf32>
    %cst_33 = arith.constant 0.000000e+00 : f32
    %38 = vector.broadcast %cst_33 : f32 to vector<8x1xf32>
    %39 = arith.subf %38, %37 : vector<8x1xf32>
    %40 = arith.select %36, %39, %37 : vector<8x1xi1>, vector<8x1xf32>
    %41 = math.absf %40 : vector<8x1xf32>
    %cst_34 = arith.constant 0.000000e+00 : f32
    %42 = vector.broadcast %cst_34 : f32 to vector<8x1xf32>
    %43 = arith.subf %42, %41 : vector<8x1xf32>
    %44 = math.exp %43 : vector<8x1xf32>
    %cst_35 = arith.constant 0.000000e+00 : f32
    %45 = vector.broadcast %cst_35 : f32 to vector<8x1xf32>
    %46 = arith.maximumf %40, %45 : vector<8x1xf32>
    %47 = math.log1p %44 : vector<8x1xf32>
    %48 = arith.addf %46, %47 : vector<8x1xf32>
    %c2 = arith.constant 2 : index
    %49 = memref.load %arg2[%c2] : memref<6xf32, #tpu.memory_space<smem>>
    %c3 = arith.constant 3 : index
    %50 = memref.load %arg2[%c3] : memref<6xf32, #tpu.memory_space<smem>>
    %51 = vector.broadcast %49 : f32 to vector<8x1xf32>
    %52 = vector.broadcast %50 : f32 to vector<8x1xf32>
    %53 = arith.select %36, %51, %52 : vector<8x1xi1>, vector<8x1xf32>
    %54 = arith.mulf %53, %48 : vector<8x1xf32>
    %55 = arith.addf %28, %54 : vector<8x1xf32>
    %c0_36 = arith.constant 0 : index
    %c2_37 = arith.constant 2 : index
    %c0_38 = arith.constant 0 : index
    %c0_39 = arith.constant 0 : index
    %c0_40 = arith.constant 0 : index
    %56 = vector.load %arg3[%c0_36, %c2_37, %c0_38, %c0_39, %c0_40] : memref<2x3x1x8x1xf32, #tpu.memory_space<vmem>>, vector<1x1x1x8x1xf32>
    %57 = vector.shape_cast %56 : vector<1x1x1x8x1xf32> to vector<8x1xf32>
    %c1_41 = arith.constant 1 : index
    %c2_42 = arith.constant 2 : index
    %c0_43 = arith.constant 0 : index
    %c0_44 = arith.constant 0 : index
    %c0_45 = arith.constant 0 : index
    %58 = vector.load %arg3[%c1_41, %c2_42, %c0_43, %c0_44, %c0_45] : memref<2x3x1x8x1xf32, #tpu.memory_space<vmem>>, vector<1x1x1x8x1xf32>
    %59 = vector.shape_cast %58 : vector<1x1x1x8x1xf32> to vector<8x1xf32>
    %c2_46 = arith.constant 2 : index
    %c0_47 = arith.constant 0 : index
    %c0_48 = arith.constant 0 : index
    %c0_49 = arith.constant 0 : index
    %60 = vector.load %arg4[%c2_46, %c0_47, %c0_48, %c0_49] : memref<3x1x8x1xi32, #tpu.memory_space<vmem>>, vector<1x1x8x1xi32>
    %61 = vector.shape_cast %60 : vector<1x1x8x1xi32> to vector<8x1xi32>
    %c0_i32_50 = arith.constant 0 : i32
    %62 = vector.broadcast %c0_i32_50 : i32 to vector<8x1xi32>
    %63 = arith.cmpi eq, %61, %62 : vector<8x1xi32>
    %64 = arith.subf %57, %59 : vector<8x1xf32>
    %cst_51 = arith.constant 0.000000e+00 : f32
    %65 = vector.broadcast %cst_51 : f32 to vector<8x1xf32>
    %66 = arith.subf %65, %64 : vector<8x1xf32>
    %67 = arith.select %63, %66, %64 : vector<8x1xi1>, vector<8x1xf32>
    %68 = math.absf %67 : vector<8x1xf32>
    %cst_52 = arith.constant 0.000000e+00 : f32
    %69 = vector.broadcast %cst_52 : f32 to vector<8x1xf32>
    %70 = arith.subf %69, %68 : vector<8x1xf32>
    %71 = math.exp %70 : vector<8x1xf32>
    %cst_53 = arith.constant 0.000000e+00 : f32
    %72 = vector.broadcast %cst_53 : f32 to vector<8x1xf32>
    %73 = arith.maximumf %67, %72 : vector<8x1xf32>
    %74 = math.log1p %71 : vector<8x1xf32>
    %75 = arith.addf %73, %74 : vector<8x1xf32>
    %c4 = arith.constant 4 : index
    %76 = memref.load %arg2[%c4] : memref<6xf32, #tpu.memory_space<smem>>
    %c5 = arith.constant 5 : index
    %77 = memref.load %arg2[%c5] : memref<6xf32, #tpu.memory_space<smem>>
    %78 = vector.broadcast %76 : f32 to vector<8x1xf32>
    %79 = vector.broadcast %77 : f32 to vector<8x1xf32>
    %80 = arith.select %63, %78, %79 : vector<8x1xi1>, vector<8x1xf32>
    %81 = arith.mulf %80, %75 : vector<8x1xf32>
    %82 = arith.addf %55, %81 : vector<8x1xf32>
    %c0_i32_54 = arith.constant 0 : i32
    %83 = arith.cmpi sge, %arg1, %c0_i32_54 : i32
    %84 = arith.extui %83 : i1 to i32
    %c0_i32_55 = arith.constant 0 : i32
    %85 = arith.cmpi ne, %84, %c0_i32_55 : i32
    scf.if %85 {
      %c1_i32 = arith.constant 1 : i32
      %89 = arith.muli %arg1, %c1_i32 : i32
      %90 = tpu.iota {dimensions = array<i32: 1>} : vector<8x1xi32>
      %91 = vector.broadcast %89 : i32 to vector<8x1xi32>
      %92 = arith.addi %91, %90 : vector<8x1xi32>
      %93 = tpu.iota {dimensions = array<i32: 0>} : vector<8x1xi32>
      %c8_i32 = arith.constant 8 : i32
      %94 = arith.muli %arg0, %c8_i32 : i32
      %95 = vector.broadcast %94 : i32 to vector<8x1xi32>
      %96 = arith.addi %95, %93 : vector<8x1xi32>
      %c1_i32_58 = arith.constant 1 : i32
      %97 = vector.broadcast %c1_i32_58 : i32 to vector<8x1xi32>
      %98 = arith.muli %96, %97 : vector<8x1xi32>
      %99 = arith.addi %98, %92 : vector<8x1xi32>
      %c1_i32_59 = arith.constant 1 : i32
      %100 = vector.broadcast %c1_i32_59 : i32 to vector<8x1xi32>
      %101 = arith.cmpi slt, %92, %100 : vector<8x1xi32>
      %c8_i32_60 = arith.constant 8 : i32
      %102 = vector.broadcast %c8_i32_60 : i32 to vector<8x1xi32>
      %103 = arith.cmpi slt, %99, %102 : vector<8x1xi32>
      %104 = arith.andi %101, %103 : vector<8x1xi1>
      %c0_61 = arith.constant 0 : index
      %c0_62 = arith.constant 0 : index
      %105 = vector.load %arg6[%c0_61, %c0_62] : memref<8x1xf32, #tpu.memory_space<vmem>>, vector<8x1xf32>
      %cst_63 = arith.constant 0.000000e+00 : f32
      %106 = vector.broadcast %cst_63 : f32 to vector<8x1xf32>
      %107 = arith.select %104, %82, %106 : vector<8x1xi1>, vector<8x1xf32>
      %108 = arith.addf %105, %107 : vector<8x1xf32>
      %c0_64 = arith.constant 0 : index
      %c0_65 = arith.constant 0 : index
      %109 = vector.load %arg6[%c0_64, %c0_65] : memref<8x1xf32, #tpu.memory_space<vmem>>, vector<8x1xf32>
      tpu.vector_store %arg6[%c0_64, %c0_65], %108 {strides = array<i32>} : memref<8x1xf32, #tpu.memory_space<vmem>>, vector<8x1xf32>,
    } else {
    }
    %c0_i32_56 = arith.constant 0 : i32
    %86 = arith.cmpi eq, %arg1, %c0_i32_56 : i32
    %87 = arith.extui %86 : i1 to i32
    %c0_i32_57 = arith.constant 0 : i32
    %88 = arith.cmpi ne, %87, %c0_i32_57 : i32
    scf.if %88 {
      %c0_58 = arith.constant 0 : index
      %c0_59 = arith.constant 0 : index
      %89 = vector.load %arg6[%c0_58, %c0_59] : memref<8x1xf32, #tpu.memory_space<vmem>>, vector<8x1xf32>
      %90 = vector.shape_cast %89 : vector<8x1xf32> to vector<1x8x1xf32>
      %cst_60 = arith.constant dense<0.000000e+00> : vector<1xf32>
      %91 = vector.multi_reduction <add>, %90, %cst_60 [1, 2] : vector<1x8x1xf32> to vector<1xf32>
      %92 = vector.shape_cast %91 : vector<1xf32> to vector<1x1x1xf32>
      %93 = vector.extract %92[0, 0, 0] : f32 from vector<1x1x1xf32>
      %94 = vector.broadcast %93 : f32 to vector<1x1x1xf32>
      %c0_61 = arith.constant 0 : index
      %c0_62 = arith.constant 0 : index
      %c0_63 = arith.constant 0 : index
      %95 = vector.load %arg5[%c0_61, %c0_62, %c0_63] : memref<1x1x1xf32, #tpu.memory_space<vmem>>, vector<1x1x1xf32>
      tpu.vector_store %arg5[%c0_61, %c0_62, %c0_63], %94 {strides = array<i32>} : memref<1x1x1xf32, #tpu.memory_space<vmem>>, vector<1x1x1xf32>,
    } else {
    }
    return
  }
  func.func @transform_0(%arg0: i32, %arg1: i32, %arg2: memref<6xf32, #tpu.memory_space<smem>>) -> (i32, i32, i32, i32, i32) {
    %c0_i32 = arith.constant 0 : i32
    %c0_i32_0 = arith.constant 0 : i32
    %c0_i32_1 = arith.constant 0 : i32
    %c0_i32_2 = arith.constant 0 : i32
    return %c0_i32, %c0_i32_0, %arg0, %c0_i32_1, %arg1 : i32, i32, i32, i32, i32
  }
  func.func @transform_1(%arg0: i32, %arg1: i32, %arg2: memref<6xf32, #tpu.memory_space<smem>>) -> (i32, i32, i32, i32) {
    %c0_i32 = arith.constant 0 : i32
    %c0_i32_0 = arith.constant 0 : i32
    %c0_i32_1 = arith.constant 0 : i32
    return %c0_i32, %arg0, %c0_i32_0, %arg1 : i32, i32, i32, i32
  }
  func.func @transform_2(%arg0: i32, %arg1: i32, %arg2: memref<6xf32, #tpu.memory_space<smem>>) -> (i32, i32, i32) {
    %c0_i32 = arith.constant 0 : i32
    %c0_i32_0 = arith.constant 0 : i32
    %c0_i32_1 = arith.constant 0 : i32
    return %arg0, %c0_i32, %c0_i32_0 : i32, i32, i32
  }
}

</mosaic_0001>

<bundles_post_ra>
// kernel: tpu_custom_call.1
= control target key start
LH: loop header
LB: loop body
LE: loop exit
PB: predicated region body
PF: predicated region fallthrough
CT: control target
= control target key end

     0   :  { %s641_s15 = smov [#allocation4]   ;;  %s806_s0 = inlined_call_operand.vmem [shape: f32[6], index: 0, kind: input, shape index: {}]   ;;  %s807_s1 = inlined_call_operand.vmem [shape: f32[2,3,2,8,1], index: 1, kind: input, shape index: {}]   ;;  %s808_s2 = inlined_call_operand.vmem [shape: s32[3,2,8,1], index: 2, kind: input, shape index: {}]   ;;  %s809_s3 = inlined_call_operand.vmem [shape: f32[2,1,1], index: 3, kind: output, shape index: {}]  }
   0x1   :  { %s9_s14 = sshll.u32 %s806_s0, 4  ;;  %s10_s14 = int_to_ptr.vmem [resolvable:$true] %s9_s14 }
   0x2   :  { %12 = dma.vmem_to_smem %s10_s14, 16, %s641_s15, [#allocation3] }
   0x3   :  { %619 = dma.done.wait [#allocation3], 16 }
   0x4   :  { %620 = vsyncadd [#allocation3], 4294967280 }
   0x5   :  { %15 = sfence }
   0x6   :  { %s666_s16 = smov 0   ;;  %s668_s17 = smov 0  }
   0x7   :  { %s670_s18 = smov 0   ;;  %s672_s19 = smov 0  }
   0x8   :  { %s674_s20 = smov 0  }
   0x9 LB: > { %s33_s0 = sadd.s32 1, %s635_s19  ;;  %p49_p1 = scmp.ne.s32.totalorder %s627_s17, %s623_s16  ;;  %s639_s20 = sphi %s674_s20, %s21_s20   ;;  %s635_s19 = sphi %s672_s19, %s816_s19   ;;  %s631_s18 = sphi %s670_s18, %s815_s18   ;;  %s627_s17 = sphi %s668_s17, %s814_s17   ;;  %s623_s16 = sphi %s666_s16, %s813_s16  }
   0xa   : > { %p35_p0 = scmp.ge.s32.totalorder %s33_s0, 2  ;;  %p50_p2 = scmp.eq.s32.totalorder %s639_s20, 0 }
   0xb   : > { %s42_s23 = sadd.s32 1, %s627_s17  ;;  %p508_p5 = scmp.ge.s32.totalorder %s639_s20, 2 }
   0xc   : > { %s818_s0 = smov (%p35_p0, %s33_s0), 0  ;;  %p697_p3 = por %p50_p2, %p49_p1 }
   0xd   : > { %s37_s22 = ssub.s32 %s635_s19, %s818_s0  ;;  %129 = sbr.rel (%p508_p5) target bundleno = 35 (0x23), region = 16 }
   0xe   : > { %p40_p4 = scmp.eq.s32.totalorder %s37_s22, 0 }
  0x10   : > { %s705_s24 = scalar_select %p40_p4, %s627_s17, %s42_s23  }
  0x12   : > { %132 = sbr.rel (!%p697_p3) target bundleno = 28 (0x1c), region = 20  ;;  %s134_s25 = sand.u32 (%p697_p3), 1, %s627_s17  }
  0x13   : > { %s509_s26 = sshll.u32 (%p697_p3), %s635_s19, 3  ;;  %s527_s27 = smul.u32 (%p697_p3), 48, %s134_s25 }
  0x14   : > { %s139_s30 = scalar_lea.vmem (%p697_p3), %s807_s1, %s509_s26 }
  0x15   : > { %v178_v0 = vld [vmem:[%s139_s30] sm:$0xff] (%p697_p3)  ;;  %v180_v1 = vld [vmem:[%s139_s30 + $0x10] sm:$0xff] (%p697_p3)  ;;  %s136_s4 = scalar_lea.vmem (%p697_p3), [#allocation5], %s527_s27 }
  0x16   : > { %v182_v2 = vld [vmem:[%s139_s30 + $0x20] sm:$0xff] (%p697_p3)  ;;  %179 = vst [vmem:[%s136_s4] sm:$0xff] (%p697_p3), %v178_v0  ;;  %v184_v3 = vld [vmem:[%s139_s30 + $0x30] sm:$0xff] (%p697_p3) }
  0x17   : > { %181 = vst [vmem:[%s136_s4 + $0x8] sm:$0xff] %v180_v1  ;;  %v186_v4 = vld [vmem:[%s139_s30 + $0x40] sm:$0xff]  ;;  %v188_v5 = vld [vmem:[%s139_s30 + $0x50] sm:$0xff] }
  0x18   : > { %183 = vst [vmem:[%s136_s4 + $0x10] sm:$0xff] %v182_v2 }
  0x19   : > { %185 = vst [vmem:[%s136_s4 + $0x18] sm:$0xff] %v184_v3 }
  0x1a   : > { %187 = vst [vmem:[%s136_s4 + $0x20] sm:$0xff] %v186_v4 }
  0x1b   : > { %189 = vst [vmem:[%s136_s4 + $0x28] sm:$0xff] %v188_v5 }
  0x1c PF: > { %195 = sbr.rel (!%p697_p3) target bundleno = 35 (0x23), region = 58  ;;  %s197_s5 = sand.u32 (%p697_p3), 1, %s627_s17  }
  0x1d   : > { %s510_s6 = sshll.u32 (%p697_p3), %s635_s19, 3  ;;  %s528_s7 = smul.u32 (%p697_p3), 24, %s197_s5 }
  0x1e   : > { %s202_s10 = scalar_lea.vmem (%p697_p3), %s808_s2, %s510_s6 }
  0x1f   : > { %v235_v6 = vld [vmem:[%s202_s10] sm:$0xff] (%p697_p3)  ;;  %v237_v7 = vld [vmem:[%s202_s10 + $0x10] sm:$0xff] (%p697_p3)  ;;  %s199_s11 = scalar_lea.vmem (%p697_p3), [#allocation6], %s528_s7 }
  0x20   : > { %v239_v8 = vld [vmem:[%s202_s10 + $0x20] sm:$0xff] (%p697_p3)  ;;  %236 = vst [vmem:[%s199_s11] sm:$0xff] (%p697_p3), %v235_v6 }
  0x21   : > { %238 = vst [vmem:[%s199_s11 + $0x8] sm:$0xff] %v237_v7 }
  0x22   : > { %240 = vst [vmem:[%s199_s11 + $0x10] sm:$0xff] %v239_v8 }
  0x23 PF: > { %p511_p6 = scmp.ge.s32.totalorder %s639_s20, 1  ;;  %p245_p7 = scmp.lt.s32.totalorder %s639_s20, 3 }
  0x25   : > { %p246_p8 = pnand %p511_p6, %p245_p7 }
  0x26   : > { %s252_s12 = sand.u32 (!%p246_p8), 1, %s623_s16   ;;  %s750_s16 = sld [smem:[#allocation4]] (!%p246_p8) }
  0x27   : > { %249 = sbr.rel (%p246_p8) target bundleno = 277 (0x115), region = 96  ;;  %s752_s22 = sld [smem:[#allocation4 + $0x1]] (!%p246_p8) }
  0x28   : > { %s529_s13 = smul.u32 (!%p246_p8), 48, %s252_s12  ;;  %s754_s23 = sld [smem:[#allocation4 + $0x2]] (!%p246_p8) }
  0x29   : > { %s530_s14 = smul.u32 (!%p246_p8), 24, %s252_s12  ;;  %s756_s25 = sld [smem:[#allocation4 + $0x3]] (!%p246_p8) }
  0x2a   : > { %s254_s15 = scalar_lea.vmem (!%p246_p8), [#allocation5], %s529_s13  ;;  %s758_s26 = sld [smem:[#allocation4 + $0x4]] (!%p246_p8) }
  0x2b   : > { %s261_s21 = scalar_lea.vmem (!%p246_p8), [#allocation6], %s530_s14  ;;  %s524_s27 = sshll.u32 (!%p246_p8), %s631_s18, 3 }
  0x2c   : > { %vm289_vm0 = vcmask 7168   ;;  %v642_v9 = vmov 0.0   ;;  %v291_v10 = vld [vmem:[%s254_s15] sm:$0xff]  ;;  %v512_v11 = vld [vmem:[%s254_s15 + $0x18] sm:$0xff]  ;;  %v514_v12 = vld [vmem:[%s254_s15 + $0x8] sm:$0xff]  ;;  %v388_v38 = vlaneseq  ;;  %s761_s28 = sld [smem:[#allocation4 + $0x5]]  ;;  %v395_v51 = vstv %s524_s27 }
  0x2d   : > { %290 = vst.msk [vmem:[#allocation2] sm:$0xff] %vm289_vm0, %v642_v9  ;;  %v726_v13 = vld [vmem:[%s261_s21] sm:$0xff]  ;;  %v296_v14 = vsub.f32 %v291_v10, %v512_v11  ;;  %v728_v16 = vld [vmem:[%s261_s21 + $0x8] sm:$0xff]  ;;  %v731_v20 = vld [vmem:[%s261_s21 + $0x10] sm:$0xff]  ;;  %v316_v54 = vstv %s750_s16  ;;  %p282_p9 = scmp.lt.s32.totalorder %s631_s18, 1  ;;  %vm422_vm10 = vcmask 0  }
  0x2e   : > { %v515_v15 = vld [vmem:[%s254_s15 + $0x20] sm:$0xff]  ;;  %vm295_vm1 = vcmp.eq.s32.totalorder %v726_v13, 0  ;;  %v519_v18 = vld [vmem:[%s254_s15 + $0x10] sm:$0xff]  ;;  %v520_v19 = vld [vmem:[%s254_s15 + $0x28] sm:$0xff]  ;;  %vm326_vm2 = vcmp.eq.s32.totalorder %v728_v16, 0  ;;  %vm358_vm3 = vcmp.eq.s32.totalorder %v731_v20, 0  ;;  %v317_v55 = vstv %s752_s22 }
  0x2f   : > { %v327_v17 = vsub.f32 %v514_v12, %v515_v15  ;;  %v297_v21 = vsub.f32 0.0, %v296_v14  ;;  %v359_v22 = vsub.f32 %v519_v18, %v520_v19  ;;  %v393_v48 = vshrl.u32 %v388_v38, 7  ;;  %s820_s18 = smov (!%p282_p9, %s631_s18), 1 }
  0x30   : > { %v347_v56 = vstv %s754_s23  ;;  %v348_v59 = vstv %s756_s25  ;;  %v389_v60 = vand.u32 127, %v388_v38  ;;  %v379_v6 = vstv %s758_s26  ;;  %s284_s4 = scalar_lea.vmem %s809_s3, %s820_s18 }
  0x31   : > { %v328_v23 = vsub.f32 0.0, %v327_v17  ;;  %v737_v24 = vsel %vm295_vm1, %v297_v21, %v296_v14  ;;  %v360_v25 = vsub.f32 0.0, %v359_v22  ;;  %v396_v61 = vadd.s32 %v395_v51, %v393_v48 }
  0x32   : > { %v299_v26 = vand.u32 2147483647, %v737_v24  ;;  %v303_v63 = vmax.f32 %v737_v24, 0.0  ;;  %v380_v10 = vstv %s761_s28  ;;  %v318_v12 = vsel %vm295_vm1, %v316_v54, %v317_v55 }
  0x33   : > { %v742_v27 = vsel %vm326_vm2, %v328_v23, %v327_v17  ;;  %v747_v29 = vsel %vm358_vm3, %v360_v25, %v359_v22  ;;  %v397_v15 = vadd.s32 %v396_v61, %v389_v60  ;;  %v349_v19 = vsel %vm326_vm2, %v347_v56, %v348_v59 }
  0x34   : > { %v330_v28 = vand.u32 2147483647, %v742_v27  ;;  %v300_v30 = vsub.f32 0.0, %v299_v26  ;;  %v362_v31 = vand.u32 2147483647, %v747_v29  ;;  %v334_v1 = vmax.f32 %v742_v27, 0.0 }
  0x35   : > { %v366_v9 = vmax.f32 %v747_v29, 0.0  ;;  %v381_v23 = vsel %vm358_vm3, %v379_v6, %v380_v10  ;;  %vm398_vm7 = vcmp.lt.s32.totalorder %v389_v60, 1  ;;  %vm399_vm8 = vcmp.lt.s32.totalorder %v397_v15, 8  ;;  %v401_v29 = vld [vmem:[#allocation2] sm:$0xff] }
  0x36   : > { %v331_v32 = vsub.f32 0.0, %v330_v28  ;;  %v301_v33 = vmul.f32 1.442695, %v300_v30  ;;  %v363_v34 = vsub.f32 0.0, %v362_v31  ;;  %vm400_vm9 = vmand %vm398_vm7, %vm399_vm8 }
  0x38   : > { %v332_v35 = vmul.f32 1.442695, %v331_v32  ;;  %575 = vpow2.f32 %v301_v33  ;;  %v364_v36 = vmul.f32 1.442695, %v363_v34 }
  0x3a   : > { %577 = vpow2.f32 %v332_v35 }
  0x3b   : > { %579 = vpow2.f32 %v364_v36 }
  0x3e   : > { %v576_v37 = vpop.eup %575 }
  0x3f   : > { %v304_v40 = vadd.f32 1.0, %v576_v37  ;;  %v307_v41 = vmul.f32 -0.5, %v576_v37  ;;  %v310_v49 = vand.u32 2147483647, %v576_v37 }
  0x40   : > { %v578_v39 = vpop.eup %577 }
  0x41   : > { %v580_v42 = vpop.eup %579  ;;  %v335_v43 = vadd.f32 1.0, %v578_v39  ;;  %v338_v44 = vmul.f32 -0.5, %v578_v39  ;;  %581 = vlog2.f32 %v304_v40  ;;  %v308_v46 = vadd.f32 1.0, %v307_v41 }
  0x42   : > { %v367_v45 = vadd.f32 1.0, %v580_v42  ;;  %v370_v47 = vmul.f32 -0.5, %v580_v42  ;;  %v341_v52 = vand.u32 2147483647, %v578_v39  ;;  %v373_v57 = vand.u32 2147483647, %v580_v42 }
  0x43   : > { %583 = vlog2.f32 %v335_v43  ;;  %v339_v50 = vadd.f32 1.0, %v338_v44  ;;  %v309_v58 = vmul.f32 %v576_v37, %v308_v46  ;;  %vm768_vm4 = vcmp.lt.f32.partialorder %v310_v49, 0.0004427343 }
  0x44   : > { %585 = vlog2.f32 %v367_v45  ;;  %v371_v53 = vadd.f32 1.0, %v370_v47  ;;  %vm342_vm5 = vcmp.lt.f32.partialorder %v341_v52, 0.0004427343  ;;  %vm374_vm6 = vcmp.lt.f32.partialorder %v373_v57, 0.0004427343 }
  0x45   : > { %v340_v2 = vmul.f32 %v578_v39, %v339_v50 }
  0x46   : > { %v372_v5 = vmul.f32 %v580_v42, %v371_v53 }
  0x47   : > { %v582_v62 = vpop.eup %581 }
  0x48   : > { %v306_v4 = vmul.f32 0.6931472, %v582_v62 }
  0x49   : > { %v584_v3 = vpop.eup %583 }
  0x4a   : > { %v586_v7 = vpop.eup %585  ;;  %v337_v8 = vmul.f32 0.6931472, %v584_v3  ;;  %v312_v11 = vsel %vm768_vm4, %v309_v58, %v306_v4 }
  0x4b   : > { %v369_v14 = vmul.f32 0.6931472, %v586_v7  ;;  %v313_v17 = vadd.f32 %v312_v11, %v303_v63 }
  0x4c   : > { %v343_v18 = vsel %vm342_vm5, %v340_v2, %v337_v8 }
  0x4d   : > { %v344_v21 = vadd.f32 %v343_v18, %v334_v1  ;;  %v375_v22 = vsel %vm374_vm6, %v372_v5, %v369_v14  ;;  %v319_v24 = vmul.f32 %v318_v12, %v313_v17 }
  0x4e   : > { %v376_v25 = vadd.f32 %v375_v22, %v366_v9 }
  0x4f   : > { %v350_v26 = vmul.f32 %v349_v19, %v344_v21 }
  0x50   : > { %v382_v27 = vmul.f32 %v381_v23, %v376_v25 }
  0x51   : > { %v351_v13 = vadd.f32 %v350_v26, %v319_v24 }
  0x53   : > { %v383_v28 = vadd.f32 %v382_v27, %v351_v13 }
  0x55   : > { %v402_v30 = vsel %vm400_vm9, %v383_v28, 0.0 }
  0x56   : > { %v403_v16 = vadd.f32 %v402_v30, %v401_v29 }
  0x58   : > { %405 = vst.msk [vmem:[#allocation2] sm:$0xff] %vm289_vm0, %v403_v16 }
  0x5f   : > { %v409_v31 = vld [vmem:[#allocation2] sm:$0xff] }
  0x60   : > { %v411_v20 = vsel %vm289_vm0, %v409_v31, 0.0 }
  0x61   : > { %412 = vadd.xlane.f32.xlu0 %v411_v20 }
  0xd4   : > { %v413_v32 = vpop.xlane.xlu0 %412 }
  0xd5   : > { %v414_v33 = vrot.slane %v413_v32, 4 }
  0xd7   : > { %v415_v34 = vadd.f32 %v414_v33, %v413_v32 }
  0xd9   : > { %v416_v35 = vrot.slane %v415_v34, 2 }
  0xdb   : > { %v417_v36 = vadd.f32 %v416_v35, %v415_v34 }
  0xdd   : > { %v418_v37 = vrot.slane %v417_v36, 1 }
  0xdf   : > { %v419_v38 = vadd.f32 %v418_v37, %v417_v36 }
  0xe1   : > { %531 = vpush %v419_v38 }
 0x112   : > { %s532_s5 = spop %531 }
 0x113   : > { %v421_v39 = vstv %s532_s5 }
 0x114   : > { %423 = vst.msk [vmem:[%s284_s4] sm:$0x1] %vm422_vm10, %v421_v39 }
 0x115 PF: > { %s21_s20 = sadd.s32 1, %s639_s20   ;;  %s813_s16 = smov %s627_s17 }
 0x116   : > { %p18_p10 = scmp.ge.s32.totalorder %s21_s20, 4   ;;  %s814_s17 = smov %s705_s24 }
 0x117   : > { %s815_s18 = smov %s635_s19  ;;  %s816_s19 = smov %s818_s0 }
 0x118   :  { %20 = sbr.rel (!%p18_p10) target bundleno = 9 (0x9), region = 166 }

</bundles_post_ra>
